<compile_context>
chip_gen: v7x
topology: tpu7x:2x2x1
jax: 0.10.0
libtpu: 0.0.40
codegen_flags: <defaults>
</compile_context>

<pallas_src>
import jax
import jax.numpy as jnp
from jax import lax
from jax.experimental import pallas as pl
from jax.experimental.pallas import tpu as pltpu

_BN_EPS = 1e-5
# Fits the scoped-VMEM budget on v5e/v6e (128 MiB phys) and v7x (64 MiB phys).
_VMEM_LIMIT_BYTES = 32 * 1024 * 1024


def _compiler_params():
    return pltpu.CompilerParams(
        dimension_semantics=("parallel",),
        vmem_limit_bytes=_VMEM_LIMIT_BYTES,
    )


def _pick_row_tile(m, candidates=(1024, 512, 256, 128, 64, 32, 16)):
    # Largest tile that evenly divides m (keeps BlockSpecs simple); fall back to full extent.
    for c in candidates:
        if m % c == 0:
            return c
    return m


def _full_spec(arr):
    ndim = arr.ndim
    return pl.BlockSpec(arr.shape, lambda *_: (0,) * ndim)


# ---------------------------------------------------------------------------
# Path A: fully fused bottleneck for stride == 1  (grid over batch)
# ---------------------------------------------------------------------------
def _fused_bottleneck_stride1(x2d, w1, b1, w2, b2, w3, b3, wr, H, W):
    """x2d: (N, H*W, Cin) bf16.  w2: (9, Cb, Cb) bf16.  wr: (Cin, Cout) bf16 or None."""
    N, HW, Cin = x2d.shape
    Cb = w1.shape[1]
    Cout = w3.shape[1]
    has_proj = wr is not None

    def kernel(*refs):
        if has_proj:
            (x_ref, w1_ref, b1_ref, w2_ref, b2_ref, w3_ref, b3_ref, wr_ref,
             o_ref, h1pad_ref) = refs
        else:
            (x_ref, w1_ref, b1_ref, w2_ref, b2_ref, w3_ref, b3_ref,
             o_ref, h1pad_ref) = refs

        x2 = x_ref[0]                                          # (H*W, Cin) bf16

        # conv1 (1x1, bn1 scale folded into w1) + shift + relu, f32 epilogue.
        h1 = jnp.dot(x2, w1_ref[...], preferred_element_type=jnp.float32)
        h1 = jnp.maximum(h1 + b1_ref[...], 0.0)                # (H*W, Cb) f32

        # Zero-padded h1 slab in VMEM (the 3x3 conv pads h1, not x).
        h1pad_ref[...] = jnp.zeros((H + 2, W + 2, Cb), jnp.float32)
        h1pad_ref[1:H + 1, 1:W + 1, :] = h1.reshape(H, W, Cb)

        # conv2 (3x3, pad=1, stride=1): nine shifted matmuls accumulated in f32.
        acc = jnp.zeros((HW, Cb), jnp.float32) + b2_ref[...]
        for t in range(9):
            dy, dx = t // 3, t % 3
            tap = h1pad_ref[dy:dy + H, dx:dx + W, :]           # (H, W, Cb) f32
            tap = tap.reshape(HW, Cb).astype(jnp.bfloat16)
            acc = acc + jnp.dot(tap, w2_ref[t], preferred_element_type=jnp.float32)
        h2 = jnp.maximum(acc, 0.0).astype(jnp.bfloat16)        # (H*W, Cb)

        # conv3 (1x1) + bn3 + residual + relu (residual bias already folded into b3).
        y = jnp.dot(h2, w3_ref[...], preferred_element_type=jnp.float32) + b3_ref[...]
        if has_proj:
            y = y + jnp.dot(x2, wr_ref[...], preferred_element_type=jnp.float32)
        else:
            y = y + x2.astype(jnp.float32)                     # identity residual: direct add
        o_ref[0] = jnp.maximum(y, 0.0)

    in_arrays = [x2d, w1, b1, w2, b2, w3, b3] + ([wr] if has_proj else [])
    in_specs = [pl.BlockSpec((1, HW, Cin), lambda n: (n, 0, 0))]
    in_specs += [_full_spec(a) for a in in_arrays[1:]]

    return pl.pallas_call(
        kernel,
        out_shape=jax.ShapeDtypeStruct((N, HW, Cout), jnp.float32),
        grid_spec=pltpu.PrefetchScalarGridSpec(
            num_scalar_prefetch=0,
            grid=(N,),
            in_specs=in_specs,
            out_specs=pl.BlockSpec((1, HW, Cout), lambda n: (n, 0, 0)),
            scratch_shapes=[pltpu.VMEM((H + 2, W + 2, Cb), jnp.float32)],
        ),
        compiler_params=_compiler_params(),
    )(*in_arrays)


# ---------------------------------------------------------------------------
# Path B: strided blocks -- conv1 kernel, wrapper im2col, fused tail kernel
# ---------------------------------------------------------------------------
def _conv1x1_bn_relu(x2d, w, b):
    """relu((M,K) @ (K,C) + b), row-tiled & pipelined; bf16 out halves HBM traffic."""
    M, K = x2d.shape
    C = w.shape[1]
    tile = _pick_row_tile(M)

    def kernel(x_ref, w_ref, b_ref, o_ref):
        y = jnp.dot(x_ref[...], w_ref[...], preferred_element_type=jnp.float32)
        o_ref[...] = jnp.maximum(y + b_ref[...], 0.0).astype(o_ref.dtype)

    return pl.pallas_call(
        kernel,
        out_shape=jax.ShapeDtypeStruct((M, C), jnp.bfloat16),
        grid_spec=pltpu.PrefetchScalarGridSpec(
            num_scalar_prefetch=0,
            grid=(M // tile,),
            in_specs=[pl.BlockSpec((tile, K), lambda i: (i, 0)),
                      _full_spec(w), _full_spec(b)],
            out_specs=pl.BlockSpec((tile, C), lambda i: (i, 0)),
        ),
        compiler_params=_compiler_params(),
    )(x2d, w, b)


def _conv2_conv3_res_fused(col, w2, b2, w3, b3, xs, wr):
    """relu( relu(col@w2 + b2) @ w3 + b3 + residual ), row-tiled & pipelined."""
    M, K2 = col.shape
    Cb = w2.shape[1]
    Cout = w3.shape[1]
    Cin = xs.shape[1]
    has_proj = wr is not None
    tile = _pick_row_tile(M)

    def kernel(*refs):
        if has_proj:
            col_ref, w2_ref, b2_ref, w3_ref, b3_ref, xs_ref, wr_ref, o_ref = refs
        else:
            col_ref, w2_ref, b2_ref, w3_ref, b3_ref, xs_ref, o_ref = refs
        h2 = jnp.dot(col_ref[...], w2_ref[...], preferred_element_type=jnp.float32)
        h2 = jnp.maximum(h2 + b2_ref[...], 0.0).astype(jnp.bfloat16)
        y = jnp.dot(h2, w3_ref[...], preferred_element_type=jnp.float32) + b3_ref[...]
        if has_proj:
            y = y + jnp.dot(xs_ref[...], wr_ref[...], preferred_element_type=jnp.float32)
        else:
            y = y + xs_ref[...].astype(jnp.float32)
        o_ref[...] = jnp.maximum(y, 0.0)

    in_arrays = [col, w2, b2, w3, b3, xs] + ([wr] if has_proj else [])
    in_specs = [pl.BlockSpec((tile, K2), lambda i: (i, 0)),
                _full_spec(w2), _full_spec(b2), _full_spec(w3), _full_spec(b3),
                pl.BlockSpec((tile, Cin), lambda i: (i, 0))]
    if has_proj:
        in_specs.append(_full_spec(wr))

    return pl.pallas_call(
        kernel,
        out_shape=jax.ShapeDtypeStruct((M, Cout), jnp.float32),
        grid_spec=pltpu.PrefetchScalarGridSpec(
            num_scalar_prefetch=0,
            grid=(M // tile,),
            in_specs=in_specs,
            out_specs=pl.BlockSpec((tile, Cout), lambda i: (i, 0)),
        ),
        compiler_params=_compiler_params(),
    )(*in_arrays)


# ---------------------------------------------------------------------------
# Glue (parameter folding, im2col, layout plumbing) -- plain JAX
# ---------------------------------------------------------------------------
def _fold_bn(bn):
    gamma, beta, mean, var = bn
    scale = gamma / jnp.sqrt(var + _BN_EPS)
    shift = beta - mean * scale
    return scale.astype(jnp.float32), shift.astype(jnp.float32)


def _im2col_3x3(x_nhwc, stride):
    # 3x3 conv, padding=1 -> (N*Ho*Wo, 9*C) patch matrix, column order (kh, kw, cin).
    N, H, W, C = x_nhwc.shape
    xp = jnp.pad(x_nhwc, ((0, 0), (1, 1), (1, 1), (0, 0)))
    Ho = (H - 1) // stride + 1
    Wo = (W - 1) // stride + 1
    cols = []
    for dy in range(3):
        for dx in range(3):
            cols.append(xp[:, dy:dy + stride * (Ho - 1) + 1:stride,
                              dx:dx + stride * (Wo - 1) + 1:stride, :])
    col = jnp.concatenate(cols, axis=-1)
    return col.reshape(N * Ho * Wo, 9 * C), (Ho, Wo)


def bottleneck_forward(params, x_nchw, stride):
    x = jnp.transpose(x_nchw, (0, 2, 3, 1)).astype(jnp.float32)       # NCHW -> NHWC
    N, H, W, Cin = x.shape
    xb = x.astype(jnp.bfloat16)                                       # bf16 in, f32 accumulate

    s1, sh1 = _fold_bn(params["bn1"])
    s2, sh2 = _fold_bn(params["bn2"])
    s3, sh3 = _fold_bn(params["bn3"])

    # Fold BN scales into the weight columns; only per-channel shifts remain in-kernel.
    w1 = (params["conv1_w"][:, :, 0, 0].T * s1[None, :]).astype(jnp.bfloat16)     # (Cin, Cb)
    Cb = w1.shape[1]
    w2_taps = jnp.transpose(params["conv2_w"], (2, 3, 1, 0)) * s2[None, None, None, :]
    w3 = (params["conv3_w"][:, :, 0, 0].T * s3[None, :]).astype(jnp.bfloat16)     # (Cb, Cout)
    Cout = w3.shape[1]

    b1 = sh1.reshape(1, Cb)
    b2 = sh2.reshape(1, Cb)
    b3 = sh3.reshape(1, Cout)

    has_proj = params["res_w"] is not None
    if has_proj:
        wr = params["res_w"][:, :, 0, 0].T.astype(jnp.bfloat16)                   # (Cin, Cout)
        b3 = b3 + params["res_b"].reshape(1, Cout).astype(jnp.float32)            # fold res bias
    else:
        wr = None

    if stride == 1 and W % 8 == 0:
        # Fully fused block: one pallas_call, grid over batch, h1 slab kept in VMEM scratch.
        w2 = w2_taps.reshape(9, Cb, Cb).astype(jnp.bfloat16)
        out = _fused_bottleneck_stride1(xb.reshape(N, H * W, Cin),
                                        w1, b1, w2, b2, w3, b3, wr, H, W)
        out = out.reshape(N, H, W, Cout)
        return jnp.transpose(out, (0, 3, 1, 2))

    # Strided (downsampling) block.
    h1 = _conv1x1_bn_relu(xb.reshape(N * H * W, Cin), w1, b1)                     # (N*H*W, Cb)
    col, (Ho, Wo) = _im2col_3x3(h1.reshape(N, H, W, Cb), stride)
    w2 = w2_taps.reshape(9 * Cb, Cb).astype(jnp.bfloat16)
    # TODO(synk): feed the strided residual slice via BlockSpec indexing instead of this
    #             wrapper-side XLA slice.
    xs = xb[:, ::stride, ::stride, :].reshape(N * Ho * Wo, Cin)
    out = _conv2_conv3_res_fused(col, w2, b2, w3, b3, xs, wr)
    out = out.reshape(N, Ho, Wo, Cout)
    return jnp.transpose(out, (0, 3, 1, 2))


# ---------------------------------------------------------------------------
# Pure-JAX reference (eval-mode BN, full f32), for correctness checking
# ---------------------------------------------------------------------------
def reference_forward(params, x, stride):
    def conv(t, w, s=1, pad=0, bias=None):
        y = lax.conv_general_dilated(t, w, (s, s), [(pad, pad), (pad, pad)],
                                     dimension_numbers=("NCHW", "OIHW", "NCHW"),
                                     precision=lax.Precision.HIGHEST)
        if bias is not None:
            y = y + bias.reshape(1, -1, 1, 1)
        return y

    def bn(t, p):
        g, b, m, v = (a.reshape(1, -1, 1, 1) for a in p)
        return (t - m) / jnp.sqrt(v + _BN_EPS) * g + b

    relu = lambda t: jnp.maximum(t, 0.0)
    out = relu(bn(conv(x, params["conv1_w"]), params["bn1"]))
    out = relu(bn(conv(out, params["conv2_w"], s=stride, pad=1), params["bn2"]))
    out = bn(conv(out, params["conv3_w"]), params["bn3"])
    residual = x if params["res_w"] is None else conv(x, params["res_w"], s=stride,
                                                      bias=params["res_b"])
    return relu(out + residual)


# ---------------------------------------------------------------------------
# Deterministic parameter init (shapes per Bottleneck.__init__)
# ---------------------------------------------------------------------------
def init_params(key, in_channels, out_channels, stride, bottleneck_ratio=4):
    Cb = out_channels // bottleneck_ratio
    ks = jax.random.split(key, 8)

    def bn_params(k, c):
        k1, k2, k3, k4 = jax.random.split(k, 4)
        gamma = 1.0 + 0.1 * jax.random.normal(k1, (c,), jnp.float32)
        beta = 0.1 * jax.random.normal(k2, (c,), jnp.float32)
        mean = 0.1 * jax.random.normal(k3, (c,), jnp.float32)
        var = jnp.abs(1.0 + 0.1 * jax.random.normal(k4, (c,), jnp.float32))
        return (gamma, beta, mean, var)

    p = {
        "conv1_w": 0.2 * jax.random.normal(ks[0], (Cb, in_channels, 1, 1), jnp.float32),
        "conv2_w": 0.2 * jax.random.normal(ks[1], (Cb, Cb, 3, 3), jnp.float32),
        "conv3_w": 0.2 * jax.random.normal(ks[2], (out_channels, Cb, 1, 1), jnp.float32),
        "bn1": bn_params(ks[3], Cb),
        "bn2": bn_params(ks[4], Cb),
        "bn3": bn_params(ks[5], out_channels),
    }
    if stride != 1 or in_channels != out_channels:
        p["res_w"] = 0.2 * jax.random.normal(ks[6], (out_channels, in_channels, 1, 1),
                                             jnp.float32)
        p["res_b"] = 0.1 * jax.random.normal(ks[7], (out_channels,), jnp.float32)
    else:
        p["res_w"] = None
        p["res_b"] = None
    return p


if __name__ == "__main__":
    key = jax.random.PRNGKey(0)
    kx, kp1, kp2, kp3 = jax.random.split(key, 4)

    x = jax.random.normal(kx, (2, 4, 16, 16), jnp.float32)    # NCHW, like PyTorch

    # bf16 activations/weights on the MXU vs an f32 HIGHEST reference -> loosened tolerance.
    ATOL = RTOL = 5e-2

    def check(out, ref, expect_shape):
        assert out.shape == expect_shape, out.shape
        err = float(jnp.abs(out - ref).max())
        assert jnp.allclose(out, ref, atol=ATOL, rtol=RTOL), err

    # Case 1: stride=2, Cin != Cout  -> strided path with residual projection
    params1 = init_params(kp1, in_channels=4, out_channels=8, stride=2)
    out1 = jax.block_until_ready(bottleneck_forward(params1, x, stride=2))
    check(out1, reference_forward(params1, x, stride=2), (2, 8, 8, 8))

    # Case 2: stride=1, Cin == Cout  -> fused path, identity residual
    params2 = init_params(kp2, in_channels=4, out_channels=4, stride=1)
    out2 = jax.block_until_ready(bottleneck_forward(params2, x, stride=1))
    check(out2, reference_forward(params2, x, stride=1), (2, 4, 16, 16))

    # Case 3: stride=1, Cin != Cout  -> fused path with residual projection
    params3 = init_params(kp3, in_channels=4, out_channels=8, stride=1)
    out3 = jax.block_until_ready(bottleneck_forward(params3, x, stride=1))
    check(out3, reference_forward(params3, x, stride=1), (2, 8, 16, 16))

    print("KERNEL_OK")
</pallas_src>

<mosaic_0001>
module attributes {stable_mosaic.version = 11 : i64} {
  func.func @kernel(%arg0: i32, %arg1: memref<512x4xbf16, #tpu.memory_space<vmem>>, %arg2: memref<4x2xbf16, #tpu.memory_space<vmem>>, %arg3: memref<1x2xf32, #tpu.memory_space<vmem>>, %arg4: memref<512x2xbf16, #tpu.memory_space<vmem>>) attributes {dimension_semantics = [#tpu.dimension_semantics<parallel>], iteration_bounds = array<i64: 1>, scalar_prefetch = 0 : i64, scratch_operands = 0 : i64, tpu.core_type = #tpu.core_type<tc>, window_params = [{transform_indices = @transform_0, window_bounds = array<i64: 512, 4>}, {pipeline_mode = #tpu.pipeline_mode<synchronous>, transform_indices = @transform_1, window_bounds = array<i64: 4, 2>}, {pipeline_mode = #tpu.pipeline_mode<synchronous>, transform_indices = @transform_2, window_bounds = array<i64: 1, 2>}, {transform_indices = @transform_3, window_bounds = array<i64: 512, 2>}]} {
    %c0 = arith.constant 0 : index
    %c0_0 = arith.constant 0 : index
    %0 = vector.load %arg1[%c0, %c0_0] : memref<512x4xbf16, #tpu.memory_space<vmem>>, vector<512x4xbf16>
    %c0_1 = arith.constant 0 : index
    %c0_2 = arith.constant 0 : index
    %1 = vector.load %arg2[%c0_1, %c0_2] : memref<4x2xbf16, #tpu.memory_space<vmem>>, vector<4x2xbf16>
    %cst = arith.constant dense<0.000000e+00> : vector<512x2xf32>
    %2 = tpu.matmul %0, %1, %cst {dimension_numbers = #tpu.dot_dimension_numbers<[1], [0], [0], [1], [0, 0, 1, 1], [], []>} : vector<512x4xbf16>, vector<4x2xbf16>, vector<512x2xf32> -> vector<512x2xf32>
    %c0_3 = arith.constant 0 : index
    %c0_4 = arith.constant 0 : index
    %3 = vector.load %arg3[%c0_3, %c0_4] : memref<1x2xf32, #tpu.memory_space<vmem>>, vector<1x2xf32>
    %4 = vector.broadcast %3 : vector<1x2xf32> to vector<512x2xf32>
    %5 = arith.addf %2, %4 : vector<512x2xf32>
    %cst_5 = arith.constant 0.000000e+00 : f32
    %6 = vector.broadcast %cst_5 : f32 to vector<512x2xf32>
    %7 = arith.maximumf %5, %6 : vector<512x2xf32>
    %8 = arith.truncf %7 : vector<512x2xf32> to vector<512x2xbf16>
    %c0_6 = arith.constant 0 : index
    %c0_7 = arith.constant 0 : index
    %9 = vector.load %arg4[%c0_6, %c0_7] : memref<512x2xbf16, #tpu.memory_space<vmem>>, vector<512x2xbf16>
    tpu.vector_store %arg4[%c0_6, %c0_7], %8 {strides = array<i32>} : memref<512x2xbf16, #tpu.memory_space<vmem>>, vector<512x2xbf16>,
    return
  }
  func.func @transform_0(%arg0: i32) -> (i32, i32) {
    %c0_i32 = arith.constant 0 : i32
    %c0_i32_0 = arith.constant 0 : i32
    return %arg0, %c0_i32 : i32, i32
  }
  func.func @transform_1(%arg0: i32) -> (i32, i32) {
    %c0_i32 = arith.constant 0 : i32
    %c0_i32_0 = arith.constant 0 : i32
    %c0_i32_1 = arith.constant 0 : i32
    return %c0_i32, %c0_i32_0 : i32, i32
  }
  func.func @transform_2(%arg0: i32) -> (i32, i32) {
    %c0_i32 = arith.constant 0 : i32
    %c0_i32_0 = arith.constant 0 : i32
    %c0_i32_1 = arith.constant 0 : i32
    return %c0_i32, %c0_i32_0 : i32, i32
  }
  func.func @transform_3(%arg0: i32) -> (i32, i32) {
    %c0_i32 = arith.constant 0 : i32
    %c0_i32_0 = arith.constant 0 : i32
    return %arg0, %c0_i32 : i32, i32
  }
}

</mosaic_0001>

<bundles_post_ra>
// kernel: tpu_custom_call.1
= control target key start
LH: loop header
LB: loop body
LE: loop exit
PB: predicated region body
PF: predicated region fallthrough
CT: control target
= control target key end

     0   :  { %vm344_vm0 = vcmask 1041408   ;;  %vm247_vm1 = vcmask 31744   ;;  %vm957_vm2 = vcmask 11264   ;;  %s1830_s1 = inlined_call_operand.vmem [shape: bf16[4,2], index: 1, kind: input, shape index: {}]   ;;  %s1831_s0 = inlined_call_operand.vmem [shape: bf16[512,4], index: 0, kind: input, shape index: {}]   ;;  %s1832_s2 = inlined_call_operand.vmem [shape: f32[1,2], index: 2, kind: input, shape index: {}]   ;;  %s1833_s3 = inlined_call_operand.vmem [shape: bf16[512,2], index: 3, kind: output, shape index: {}]  }
   0x1   :  { %v79_v0 = vld [vmem:[%s1830_s1] sm:$0x3]  ;;  %v1324_v4 = vld [vmem:[%s1831_s0 + $0x8] sm:$0xff]   ;;  %v1326_v6 = vld [vmem:[%s1831_s0 + $0x10] sm:$0xff]  }
   0x2   :  { %1320 = vmatprep.subr.msk.bf16.mxu0 %vm344_vm0, %v79_v0  ;;  %1321 = vmatprep.subr.msk.bf16.mxu1 %vm344_vm0, %v79_v0  ;;  %v346_v1 = vsel %vm344_vm0, %v79_v0, 0  ;;  %v1322_v2 = vld [vmem:[%s1831_s0] sm:$0xff]   ;;  %v1325_v5 = vld [vmem:[%s1831_s0 + $0x88] sm:$0xff]   ;;  %v1327_v7 = vld [vmem:[%s1831_s0 + $0x90] sm:$0xff]  }
   0x3   :  { %1253 = vmatpush3.bf16.msra.mxu0 %v346_v1  ;;  %1319 = vmatpush3.bf16.msra.mxu1 %v346_v1  ;;  %v1323_v3 = vld [vmem:[%s1831_s0 + $0x80] sm:$0xff]   ;;  %v1328_v8 = vld [vmem:[%s1831_s0 + $0x18] sm:$0xff]   ;;  %v1332_v12 = vld [vmem:[%s1831_s0 + $0x28] sm:$0xff]  }
   0x4   :  { %1254 = vmatprep.mubr.msk.bf16.mxu0 %vm247_vm1, %v1322_v2  ;;  %1286 = vmatprep.mubr.msk.bf16.mxu1 %vm247_vm1, %v1323_v3  ;;  %v1329_v9 = vld [vmem:[%s1831_s0 + $0x98] sm:$0xff]   ;;  %v1330_v10 = vld [vmem:[%s1831_s0 + $0x20] sm:$0xff]   ;;  %v1333_v13 = vld [vmem:[%s1831_s0 + $0xa8] sm:$0xff]  }
   0x5   :  { %v1331_v11 = vld [vmem:[%s1831_s0 + $0xa0] sm:$0xff]   ;;  %v1334_v14 = vld [vmem:[%s1831_s0 + $0x30] sm:$0xff]   ;;  %v1336_v16 = vld [vmem:[%s1831_s0 + $0x38] sm:$0xff]  }
   0x6   :  { %1255 = vmatmul.mubr.msk.bf16.vlgmr.msra.gmra.mrb[0].mxu0 %vm247_vm1, %v1324_v4  ;;  %1287 = vmatmul.mubr.msk.bf16.vlgmr.msra.gmra.mrb[0].mxu1 %vm247_vm1, %v1325_v5  ;;  %v1335_v15 = vld [vmem:[%s1831_s0 + $0xb0] sm:$0xff]   ;;  %v1337_v17 = vld [vmem:[%s1831_s0 + $0xb8] sm:$0xff]   ;;  %v1338_v18 = vld [vmem:[%s1831_s0 + $0x40] sm:$0xff]  }
   0x7   :  { %1258 = vmatprep.mubr.msk.bf16.mxu0 %vm247_vm1, %v1326_v6  ;;  %1290 = vmatprep.mubr.msk.bf16.mxu1 %vm247_vm1, %v1327_v7  ;;  %v1339_v19 = vld [vmem:[%s1831_s0 + $0xc0] sm:$0xff]   ;;  %v1340_v20 = vld [vmem:[%s1831_s0 + $0x48] sm:$0xff]   ;;  %v1342_v22 = vld [vmem:[%s1831_s0 + $0x50] sm:$0xff]  }
   0x8   :  { %v1341_v21 = vld [vmem:[%s1831_s0 + $0xc8] sm:$0xff]   ;;  %v1343_v23 = vld [vmem:[%s1831_s0 + $0xd0] sm:$0xff]   ;;  %v1344_v24 = vld [vmem:[%s1831_s0 + $0x58] sm:$0xff]  }
   0x9   :  { %v1345_v25 = vld [vmem:[%s1831_s0 + $0xd8] sm:$0xff]   ;;  %v1346_v26 = vld [vmem:[%s1831_s0 + $0x60] sm:$0xff]   ;;  %v1348_v28 = vld [vmem:[%s1831_s0 + $0x68] sm:$0xff]  }
   0xa   :  { %v1347_v27 = vld [vmem:[%s1831_s0 + $0xe0] sm:$0xff]   ;;  %v1349_v29 = vld [vmem:[%s1831_s0 + $0xe8] sm:$0xff]   ;;  %v1350_v30 = vld [vmem:[%s1831_s0 + $0x70] sm:$0xff]  }
   0xb   :  { %v1351_v31 = vld [vmem:[%s1831_s0 + $0xf0] sm:$0xff]   ;;  %v1352_v32 = vld [vmem:[%s1831_s0 + $0x78] sm:$0xff]   ;;  %v1508_v34 = vld [vmem:[%s1832_s2] ss:$0 sm:$0xff] }
   0xc   :  { %v1353_v33 = vld [vmem:[%s1831_s0 + $0xf8] sm:$0xff]  }
   0xe   :  { %1259 = vmatmul.mubr.msk.bf16.gmra.mrb[4].mxu0 %vm247_vm1, %v1328_v8  ;;  %1291 = vmatmul.mubr.msk.bf16.gmra.mrb[4].mxu1 %vm247_vm1, %v1329_v9 }
   0xf   :  { %1262 = vmatprep.mubr.msk.bf16.mxu0 %vm247_vm1, %v1330_v10  ;;  %1294 = vmatprep.mubr.msk.bf16.mxu1 %vm247_vm1, %v1331_v11 }
  0x16   :  { %1263 = vmatmul.mubr.msk.bf16.gmra.mrb[8].mxu0 %vm247_vm1, %v1332_v12  ;;  %1295 = vmatmul.mubr.msk.bf16.gmra.mrb[8].mxu1 %vm247_vm1, %v1333_v13 }
  0x17   :  { %1266 = vmatprep.mubr.msk.bf16.mxu0 %vm247_vm1, %v1334_v14  ;;  %1298 = vmatprep.mubr.msk.bf16.mxu1 %vm247_vm1, %v1335_v15 }
  0x1e   :  { %1267 = vmatmul.mubr.msk.bf16.gmra.mrb[12].mxu0 %vm247_vm1, %v1336_v16  ;;  %1299 = vmatmul.mubr.msk.bf16.gmra.mrb[12].mxu1 %vm247_vm1, %v1337_v17 }
  0x1f   :  { %1270 = vmatprep.mubr.msk.bf16.mxu0 %vm247_vm1, %v1338_v18  ;;  %1302 = vmatprep.mubr.msk.bf16.mxu1 %vm247_vm1, %v1339_v19 }
  0x26   :  { %1271 = vmatmul.mubr.msk.bf16.gmra.mrb[16].mxu0 %vm247_vm1, %v1340_v20  ;;  %1303 = vmatmul.mubr.msk.bf16.gmra.mrb[16].mxu1 %vm247_vm1, %v1341_v21 }
  0x27   :  { %1274 = vmatprep.mubr.msk.bf16.mxu0 %vm247_vm1, %v1342_v22  ;;  %1306 = vmatprep.mubr.msk.bf16.mxu1 %vm247_vm1, %v1343_v23 }
  0x2e   :  { %1275 = vmatmul.mubr.msk.bf16.gmra.mrb[20].mxu0 %vm247_vm1, %v1344_v24  ;;  %1307 = vmatmul.mubr.msk.bf16.gmra.mrb[20].mxu1 %vm247_vm1, %v1345_v25 }
  0x2f   :  { %1278 = vmatprep.mubr.msk.bf16.mxu0 %vm247_vm1, %v1346_v26  ;;  %1310 = vmatprep.mubr.msk.bf16.mxu1 %vm247_vm1, %v1347_v27 }
  0x36   :  { %1279 = vmatmul.mubr.msk.bf16.gmra.mrb[24].mxu0 %vm247_vm1, %v1348_v28  ;;  %1311 = vmatmul.mubr.msk.bf16.gmra.mrb[24].mxu1 %vm247_vm1, %v1349_v29 }
  0x37   :  { %1282 = vmatprep.mubr.msk.bf16.mxu0 %vm247_vm1, %v1350_v30  ;;  %1314 = vmatprep.mubr.msk.bf16.mxu1 %vm247_vm1, %v1351_v31 }
  0x3e   :  { %1283 = vmatmul.mubr.msk.bf16.gmra.mrb[28].mxu0 %vm247_vm1, %v1352_v32  ;;  %1315 = vmatmul.mubr.msk.bf16.gmra.mrb[28].mxu1 %vm247_vm1, %v1353_v33 }
  0xd9   :  { %v1256_v35 = vpop.f32.mrb[0].mxu0  ;;  %v1288_v37 = vpop.f32.mrb[0].mxu1 }
  0xda   :  { %v391_v36 = vadd.f32 %v1256_v35, %v1508_v34  ;;  %v382_v38 = vpop.f32.mrb[1].mxu0  ;;  %v519_v39 = vadd.f32 %v1288_v37, %v1508_v34  ;;  %v510_v41 = vpop.f32.mrb[1].mxu1 }
  0xdb   :  { %v383_v40 = vadd.f32 %v1508_v34, %v382_v38  ;;  %v1257_v42 = vpop.f32.mrb[2].mxu0  ;;  %v511_v44 = vadd.f32 %v1508_v34, %v510_v41  ;;  %v1289_v46 = vpop.f32.mrb[2].mxu1 }
  0xdc   :  { %v639_v43 = vmax.f32 %v391_v36, 0.0  ;;  %v394_v45 = vadd.f32 %v1257_v42, %v1508_v34  ;;  %v385_v47 = vpop.f32.mrb[3].mxu0  ;;  %v671_v48 = vmax.f32 %v519_v39, 0.0  ;;  %v522_v50 = vadd.f32 %v1289_v46, %v1508_v34  ;;  %v513_v52 = vpop.f32.mrb[3].mxu1 }
  0xdd   :  { %v637_v49 = vmax.f32 %v383_v40, 0.0  ;;  %v386_v51 = vadd.f32 %v1508_v34, %v385_v47  ;;  %v669_v54 = vmax.f32 %v511_v44, 0.0  ;;  %v514_v56 = vadd.f32 %v1508_v34, %v513_v52 }
  0xde   :  { %v1157_v53 = vpack.c.bf16 %v639_v43, %v639_v43  ;;  %v640_v55 = vmax.f32 %v394_v45, 0.0  ;;  %v1189_v57 = vpack.c.bf16 %v671_v48, %v671_v48  ;;  %v672_v59 = vmax.f32 %v522_v50, 0.0 }
  0xdf   :  { %v1155_v58 = vpack.c.bf16 %v637_v49, %v637_v49  ;;  %v638_v60 = vmax.f32 %v386_v51, 0.0  ;;  %v1187_v61 = vpack.c.bf16 %v669_v54, %v669_v54  ;;  %v670_v63 = vmax.f32 %v514_v56, 0.0 }
  0xe0   :  { %960 = vst.msk [vmem:[%s1833_s3 + $0x8] sm:$0xf] %vm957_vm2, %v1157_v53  ;;  %v1158_v62 = vpack.c.bf16 %v640_v55, %v640_v55  ;;  %992 = vst.msk [vmem:[%s1833_s3 + $0x88] sm:$0xf] %vm957_vm2, %v1189_v57  ;;  %v1190_v0 = vpack.c.bf16 %v672_v59, %v672_v59 }
  0xe1   :  { %958 = vst.msk [vmem:[%s1833_s3] sm:$0xf] %vm957_vm2, %v1155_v58  ;;  %v1156_v1 = vpack.c.bf16 %v638_v60, %v638_v60  ;;  %v1260_v2 = vpop.f32.mrb[4].mxu0  ;;  %990 = vst.msk [vmem:[%s1833_s3 + $0x80] sm:$0xf] %vm957_vm2, %v1187_v61  ;;  %v1188_v3 = vpack.c.bf16 %v670_v63, %v670_v63  ;;  %v1292_v5 = vpop.f32.mrb[4].mxu1 }
  0xe2   :  { %961 = vst.msk [vmem:[%s1833_s3 + $0xc] sm:$0xf] %vm957_vm2, %v1158_v62  ;;  %v407_v4 = vadd.f32 %v1260_v2, %v1508_v34  ;;  %v398_v6 = vpop.f32.mrb[5].mxu0  ;;  %993 = vst.msk [vmem:[%s1833_s3 + $0x8c] sm:$0xf] %vm957_vm2, %v1190_v0  ;;  %v535_v7 = vadd.f32 %v1292_v5, %v1508_v34  ;;  %v526_v9 = vpop.f32.mrb[5].mxu1 }
  0xe3   :  { %959 = vst.msk [vmem:[%s1833_s3 + $0x4] sm:$0xf] %vm957_vm2, %v1156_v1  ;;  %v399_v8 = vadd.f32 %v1508_v34, %v398_v6  ;;  %v1261_v10 = vpop.f32.mrb[6].mxu0  ;;  %991 = vst.msk [vmem:[%s1833_s3 + $0x84] sm:$0xf] %vm957_vm2, %v1188_v3  ;;  %v527_v12 = vadd.f32 %v1508_v34, %v526_v9  ;;  %v1293_v14 = vpop.f32.mrb[6].mxu1 }
  0xe4   :  { %v643_v11 = vmax.f32 %v407_v4, 0.0  ;;  %v410_v13 = vadd.f32 %v1261_v10, %v1508_v34  ;;  %v401_v15 = vpop.f32.mrb[7].mxu0  ;;  %v675_v16 = vmax.f32 %v535_v7, 0.0  ;;  %v538_v18 = vadd.f32 %v1293_v14, %v1508_v34  ;;  %v529_v20 = vpop.f32.mrb[7].mxu1 }
  0xe5   :  { %v641_v17 = vmax.f32 %v399_v8, 0.0  ;;  %v402_v19 = vadd.f32 %v1508_v34, %v401_v15  ;;  %v673_v22 = vmax.f32 %v527_v12, 0.0  ;;  %v530_v24 = vadd.f32 %v1508_v34, %v529_v20 }
  0xe6   :  { %v1161_v21 = vpack.c.bf16 %v643_v11, %v643_v11  ;;  %v644_v23 = vmax.f32 %v410_v13, 0.0  ;;  %v1193_v25 = vpack.c.bf16 %v675_v16, %v675_v16  ;;  %v676_v27 = vmax.f32 %v538_v18, 0.0 }
  0xe7   :  { %v1159_v26 = vpack.c.bf16 %v641_v17, %v641_v17  ;;  %v642_v28 = vmax.f32 %v402_v19, 0.0  ;;  %v1191_v29 = vpack.c.bf16 %v673_v22, %v673_v22  ;;  %v674_v31 = vmax.f32 %v530_v24, 0.0 }
  0xe8   :  { %964 = vst.msk [vmem:[%s1833_s3 + $0x18] sm:$0xf] %vm957_vm2, %v1161_v21  ;;  %v1162_v30 = vpack.c.bf16 %v644_v23, %v644_v23  ;;  %996 = vst.msk [vmem:[%s1833_s3 + $0x98] sm:$0xf] %vm957_vm2, %v1193_v25  ;;  %v1194_v32 = vpack.c.bf16 %v676_v27, %v676_v27 }
  0xe9   :  { %962 = vst.msk [vmem:[%s1833_s3 + $0x10] sm:$0xf] %vm957_vm2, %v1159_v26  ;;  %v1160_v33 = vpack.c.bf16 %v642_v28, %v642_v28  ;;  %v1264_v35 = vpop.f32.mrb[8].mxu0  ;;  %994 = vst.msk [vmem:[%s1833_s3 + $0x90] sm:$0xf] %vm957_vm2, %v1191_v29  ;;  %v1192_v36 = vpack.c.bf16 %v674_v31, %v674_v31  ;;  %v1296_v38 = vpop.f32.mrb[8].mxu1 }
  0xea   :  { %965 = vst.msk [vmem:[%s1833_s3 + $0x1c] sm:$0xf] %vm957_vm2, %v1162_v30  ;;  %v423_v37 = vadd.f32 %v1264_v35, %v1508_v34  ;;  %v414_v39 = vpop.f32.mrb[9].mxu0  ;;  %997 = vst.msk [vmem:[%s1833_s3 + $0x9c] sm:$0xf] %vm957_vm2, %v1194_v32  ;;  %v551_v40 = vadd.f32 %v1296_v38, %v1508_v34  ;;  %v542_v42 = vpop.f32.mrb[9].mxu1 }
  0xeb   :  { %963 = vst.msk [vmem:[%s1833_s3 + $0x14] sm:$0xf] %vm957_vm2, %v1160_v33  ;;  %v415_v41 = vadd.f32 %v1508_v34, %v414_v39  ;;  %v1265_v43 = vpop.f32.mrb[10].mxu0  ;;  %995 = vst.msk [vmem:[%s1833_s3 + $0x94] sm:$0xf] %vm957_vm2, %v1192_v36  ;;  %v543_v45 = vadd.f32 %v1508_v34, %v542_v42  ;;  %v1297_v47 = vpop.f32.mrb[10].mxu1 }
  0xec   :  { %v647_v44 = vmax.f32 %v423_v37, 0.0  ;;  %v426_v46 = vadd.f32 %v1265_v43, %v1508_v34  ;;  %v417_v48 = vpop.f32.mrb[11].mxu0  ;;  %v679_v49 = vmax.f32 %v551_v40, 0.0  ;;  %v554_v51 = vadd.f32 %v1297_v47, %v1508_v34  ;;  %v545_v53 = vpop.f32.mrb[11].mxu1 }
  0xed   :  { %v645_v50 = vmax.f32 %v415_v41, 0.0  ;;  %v418_v52 = vadd.f32 %v1508_v34, %v417_v48  ;;  %v677_v55 = vmax.f32 %v543_v45, 0.0  ;;  %v546_v57 = vadd.f32 %v1508_v34, %v545_v53 }
  0xee   :  { %v1165_v54 = vpack.c.bf16 %v647_v44, %v647_v44  ;;  %v648_v56 = vmax.f32 %v426_v46, 0.0  ;;  %v1197_v58 = vpack.c.bf16 %v679_v49, %v679_v49  ;;  %v680_v60 = vmax.f32 %v554_v51, 0.0 }
  0xef   :  { %v1163_v59 = vpack.c.bf16 %v645_v50, %v645_v50  ;;  %v646_v61 = vmax.f32 %v418_v52, 0.0  ;;  %v1195_v62 = vpack.c.bf16 %v677_v55, %v677_v55  ;;  %v678_v0 = vmax.f32 %v546_v57, 0.0 }
  0xf0   :  { %968 = vst.msk [vmem:[%s1833_s3 + $0x28] sm:$0xf] %vm957_vm2, %v1165_v54  ;;  %v1166_v63 = vpack.c.bf16 %v648_v56, %v648_v56  ;;  %1000 = vst.msk [vmem:[%s1833_s3 + $0xa8] sm:$0xf] %vm957_vm2, %v1197_v58  ;;  %v1198_v1 = vpack.c.bf16 %v680_v60, %v680_v60 }
  0xf1   :  { %966 = vst.msk [vmem:[%s1833_s3 + $0x20] sm:$0xf] %vm957_vm2, %v1163_v59  ;;  %v1164_v2 = vpack.c.bf16 %v646_v61, %v646_v61  ;;  %v1268_v3 = vpop.f32.mrb[12].mxu0  ;;  %998 = vst.msk [vmem:[%s1833_s3 + $0xa0] sm:$0xf] %vm957_vm2, %v1195_v62  ;;  %v1196_v4 = vpack.c.bf16 %v678_v0, %v678_v0  ;;  %v1300_v6 = vpop.f32.mrb[12].mxu1 }
  0xf2   :  { %969 = vst.msk [vmem:[%s1833_s3 + $0x2c] sm:$0xf] %vm957_vm2, %v1166_v63  ;;  %v439_v5 = vadd.f32 %v1268_v3, %v1508_v34  ;;  %v430_v7 = vpop.f32.mrb[13].mxu0  ;;  %1001 = vst.msk [vmem:[%s1833_s3 + $0xac] sm:$0xf] %vm957_vm2, %v1198_v1  ;;  %v567_v8 = vadd.f32 %v1300_v6, %v1508_v34  ;;  %v558_v10 = vpop.f32.mrb[13].mxu1 }
  0xf3   :  { %967 = vst.msk [vmem:[%s1833_s3 + $0x24] sm:$0xf] %vm957_vm2, %v1164_v2  ;;  %v431_v9 = vadd.f32 %v1508_v34, %v430_v7  ;;  %v1269_v11 = vpop.f32.mrb[14].mxu0  ;;  %999 = vst.msk [vmem:[%s1833_s3 + $0xa4] sm:$0xf] %vm957_vm2, %v1196_v4  ;;  %v559_v13 = vadd.f32 %v1508_v34, %v558_v10  ;;  %v1301_v15 = vpop.f32.mrb[14].mxu1 }
  0xf4   :  { %v651_v12 = vmax.f32 %v439_v5, 0.0  ;;  %v442_v14 = vadd.f32 %v1269_v11, %v1508_v34  ;;  %v433_v16 = vpop.f32.mrb[15].mxu0  ;;  %v683_v17 = vmax.f32 %v567_v8, 0.0  ;;  %v570_v19 = vadd.f32 %v1301_v15, %v1508_v34  ;;  %v561_v21 = vpop.f32.mrb[15].mxu1 }
  0xf5   :  { %v649_v18 = vmax.f32 %v431_v9, 0.0  ;;  %v434_v20 = vadd.f32 %v1508_v34, %v433_v16  ;;  %v681_v23 = vmax.f32 %v559_v13, 0.0  ;;  %v562_v25 = vadd.f32 %v1508_v34, %v561_v21 }
  0xf6   :  { %v1169_v22 = vpack.c.bf16 %v651_v12, %v651_v12  ;;  %v652_v24 = vmax.f32 %v442_v14, 0.0  ;;  %v1201_v26 = vpack.c.bf16 %v683_v17, %v683_v17  ;;  %v684_v28 = vmax.f32 %v570_v19, 0.0 }
  0xf7   :  { %v1167_v27 = vpack.c.bf16 %v649_v18, %v649_v18  ;;  %v650_v29 = vmax.f32 %v434_v20, 0.0  ;;  %v1199_v30 = vpack.c.bf16 %v681_v23, %v681_v23  ;;  %v682_v32 = vmax.f32 %v562_v25, 0.0 }
  0xf8   :  { %972 = vst.msk [vmem:[%s1833_s3 + $0x38] sm:$0xf] %vm957_vm2, %v1169_v22  ;;  %v1170_v31 = vpack.c.bf16 %v652_v24, %v652_v24  ;;  %1004 = vst.msk [vmem:[%s1833_s3 + $0xb8] sm:$0xf] %vm957_vm2, %v1201_v26  ;;  %v1202_v33 = vpack.c.bf16 %v684_v28, %v684_v28 }
  0xf9   :  { %970 = vst.msk [vmem:[%s1833_s3 + $0x30] sm:$0xf] %vm957_vm2, %v1167_v27  ;;  %v1168_v35 = vpack.c.bf16 %v650_v29, %v650_v29  ;;  %v1272_v36 = vpop.f32.mrb[16].mxu0  ;;  %1002 = vst.msk [vmem:[%s1833_s3 + $0xb0] sm:$0xf] %vm957_vm2, %v1199_v30  ;;  %v1200_v37 = vpack.c.bf16 %v682_v32, %v682_v32  ;;  %v1304_v39 = vpop.f32.mrb[16].mxu1 }
  0xfa   :  { %973 = vst.msk [vmem:[%s1833_s3 + $0x3c] sm:$0xf] %vm957_vm2, %v1170_v31  ;;  %v455_v38 = vadd.f32 %v1272_v36, %v1508_v34  ;;  %v446_v40 = vpop.f32.mrb[17].mxu0  ;;  %1005 = vst.msk [vmem:[%s1833_s3 + $0xbc] sm:$0xf] %vm957_vm2, %v1202_v33  ;;  %v583_v41 = vadd.f32 %v1304_v39, %v1508_v34  ;;  %v574_v43 = vpop.f32.mrb[17].mxu1 }
  0xfb   :  { %971 = vst.msk [vmem:[%s1833_s3 + $0x34] sm:$0xf] %vm957_vm2, %v1168_v35  ;;  %v447_v42 = vadd.f32 %v1508_v34, %v446_v40  ;;  %v1273_v44 = vpop.f32.mrb[18].mxu0  ;;  %1003 = vst.msk [vmem:[%s1833_s3 + $0xb4] sm:$0xf] %vm957_vm2, %v1200_v37  ;;  %v575_v46 = vadd.f32 %v1508_v34, %v574_v43  ;;  %v1305_v48 = vpop.f32.mrb[18].mxu1 }
  0xfc   :  { %v655_v45 = vmax.f32 %v455_v38, 0.0  ;;  %v458_v47 = vadd.f32 %v1273_v44, %v1508_v34  ;;  %v449_v49 = vpop.f32.mrb[19].mxu0  ;;  %v687_v50 = vmax.f32 %v583_v41, 0.0  ;;  %v586_v52 = vadd.f32 %v1305_v48, %v1508_v34  ;;  %v577_v54 = vpop.f32.mrb[19].mxu1 }
  0xfd   :  { %v653_v51 = vmax.f32 %v447_v42, 0.0  ;;  %v450_v53 = vadd.f32 %v1508_v34, %v449_v49  ;;  %v685_v56 = vmax.f32 %v575_v46, 0.0  ;;  %v578_v58 = vadd.f32 %v1508_v34, %v577_v54 }
  0xfe   :  { %v1173_v55 = vpack.c.bf16 %v655_v45, %v655_v45  ;;  %v656_v57 = vmax.f32 %v458_v47, 0.0  ;;  %v1205_v59 = vpack.c.bf16 %v687_v50, %v687_v50  ;;  %v688_v61 = vmax.f32 %v586_v52, 0.0 }
  0xff   :  { %v1171_v60 = vpack.c.bf16 %v653_v51, %v653_v51  ;;  %v654_v62 = vmax.f32 %v450_v53, 0.0  ;;  %v1203_v63 = vpack.c.bf16 %v685_v56, %v685_v56  ;;  %v686_v1 = vmax.f32 %v578_v58, 0.0 }
 0x100   :  { %976 = vst.msk [vmem:[%s1833_s3 + $0x48] sm:$0xf] %vm957_vm2, %v1173_v55  ;;  %v1174_v0 = vpack.c.bf16 %v656_v57, %v656_v57  ;;  %1008 = vst.msk [vmem:[%s1833_s3 + $0xc8] sm:$0xf] %vm957_vm2, %v1205_v59  ;;  %v1206_v2 = vpack.c.bf16 %v688_v61, %v688_v61 }
 0x101   :  { %974 = vst.msk [vmem:[%s1833_s3 + $0x40] sm:$0xf] %vm957_vm2, %v1171_v60  ;;  %v1172_v3 = vpack.c.bf16 %v654_v62, %v654_v62  ;;  %v1276_v4 = vpop.f32.mrb[20].mxu0  ;;  %1006 = vst.msk [vmem:[%s1833_s3 + $0xc0] sm:$0xf] %vm957_vm2, %v1203_v63  ;;  %v1204_v5 = vpack.c.bf16 %v686_v1, %v686_v1  ;;  %v1308_v7 = vpop.f32.mrb[20].mxu1 }
 0x102   :  { %977 = vst.msk [vmem:[%s1833_s3 + $0x4c] sm:$0xf] %vm957_vm2, %v1174_v0  ;;  %v471_v6 = vadd.f32 %v1276_v4, %v1508_v34  ;;  %v462_v8 = vpop.f32.mrb[21].mxu0  ;;  %1009 = vst.msk [vmem:[%s1833_s3 + $0xcc] sm:$0xf] %vm957_vm2, %v1206_v2  ;;  %v599_v9 = vadd.f32 %v1308_v7, %v1508_v34  ;;  %v590_v11 = vpop.f32.mrb[21].mxu1 }
 0x103   :  { %975 = vst.msk [vmem:[%s1833_s3 + $0x44] sm:$0xf] %vm957_vm2, %v1172_v3  ;;  %v463_v10 = vadd.f32 %v1508_v34, %v462_v8  ;;  %v1277_v12 = vpop.f32.mrb[22].mxu0  ;;  %1007 = vst.msk [vmem:[%s1833_s3 + $0xc4] sm:$0xf] %vm957_vm2, %v1204_v5  ;;  %v591_v14 = vadd.f32 %v1508_v34, %v590_v11  ;;  %v1309_v16 = vpop.f32.mrb[22].mxu1 }
 0x104   :  { %v659_v13 = vmax.f32 %v471_v6, 0.0  ;;  %v474_v15 = vadd.f32 %v1277_v12, %v1508_v34  ;;  %v465_v17 = vpop.f32.mrb[23].mxu0  ;;  %v691_v18 = vmax.f32 %v599_v9, 0.0  ;;  %v602_v20 = vadd.f32 %v1309_v16, %v1508_v34  ;;  %v593_v22 = vpop.f32.mrb[23].mxu1 }
 0x105   :  { %v657_v19 = vmax.f32 %v463_v10, 0.0  ;;  %v466_v21 = vadd.f32 %v1508_v34, %v465_v17  ;;  %v689_v24 = vmax.f32 %v591_v14, 0.0  ;;  %v594_v26 = vadd.f32 %v1508_v34, %v593_v22 }
 0x106   :  { %v1177_v23 = vpack.c.bf16 %v659_v13, %v659_v13  ;;  %v660_v25 = vmax.f32 %v474_v15, 0.0  ;;  %v1209_v27 = vpack.c.bf16 %v691_v18, %v691_v18  ;;  %v692_v29 = vmax.f32 %v602_v20, 0.0 }
 0x107   :  { %v1175_v28 = vpack.c.bf16 %v657_v19, %v657_v19  ;;  %v658_v30 = vmax.f32 %v466_v21, 0.0  ;;  %v1207_v31 = vpack.c.bf16 %v689_v24, %v689_v24  ;;  %v690_v33 = vmax.f32 %v594_v26, 0.0 }
 0x108   :  { %980 = vst.msk [vmem:[%s1833_s3 + $0x58] sm:$0xf] %vm957_vm2, %v1177_v23  ;;  %v1178_v32 = vpack.c.bf16 %v660_v25, %v660_v25  ;;  %1012 = vst.msk [vmem:[%s1833_s3 + $0xd8] sm:$0xf] %vm957_vm2, %v1209_v27  ;;  %v1210_v35 = vpack.c.bf16 %v692_v29, %v692_v29 }
 0x109   :  { %978 = vst.msk [vmem:[%s1833_s3 + $0x50] sm:$0xf] %vm957_vm2, %v1175_v28  ;;  %v1176_v36 = vpack.c.bf16 %v658_v30, %v658_v30  ;;  %v1280_v37 = vpop.f32.mrb[24].mxu0  ;;  %1010 = vst.msk [vmem:[%s1833_s3 + $0xd0] sm:$0xf] %vm957_vm2, %v1207_v31  ;;  %v1208_v38 = vpack.c.bf16 %v690_v33, %v690_v33  ;;  %v1312_v40 = vpop.f32.mrb[24].mxu1 }
 0x10a   :  { %981 = vst.msk [vmem:[%s1833_s3 + $0x5c] sm:$0xf] %vm957_vm2, %v1178_v32  ;;  %v487_v39 = vadd.f32 %v1280_v37, %v1508_v34  ;;  %v478_v41 = vpop.f32.mrb[25].mxu0  ;;  %1013 = vst.msk [vmem:[%s1833_s3 + $0xdc] sm:$0xf] %vm957_vm2, %v1210_v35  ;;  %v615_v42 = vadd.f32 %v1312_v40, %v1508_v34  ;;  %v606_v44 = vpop.f32.mrb[25].mxu1 }
 0x10b   :  { %979 = vst.msk [vmem:[%s1833_s3 + $0x54] sm:$0xf] %vm957_vm2, %v1176_v36  ;;  %v479_v43 = vadd.f32 %v1508_v34, %v478_v41  ;;  %v1281_v45 = vpop.f32.mrb[26].mxu0  ;;  %1011 = vst.msk [vmem:[%s1833_s3 + $0xd4] sm:$0xf] %vm957_vm2, %v1208_v38  ;;  %v607_v47 = vadd.f32 %v1508_v34, %v606_v44  ;;  %v1313_v49 = vpop.f32.mrb[26].mxu1 }
 0x10c   :  { %v663_v46 = vmax.f32 %v487_v39, 0.0  ;;  %v490_v48 = vadd.f32 %v1281_v45, %v1508_v34  ;;  %v481_v50 = vpop.f32.mrb[27].mxu0  ;;  %v695_v51 = vmax.f32 %v615_v42, 0.0  ;;  %v618_v53 = vadd.f32 %v1313_v49, %v1508_v34  ;;  %v609_v55 = vpop.f32.mrb[27].mxu1 }
 0x10d   :  { %v661_v52 = vmax.f32 %v479_v43, 0.0  ;;  %v482_v54 = vadd.f32 %v1508_v34, %v481_v50  ;;  %v693_v57 = vmax.f32 %v607_v47, 0.0  ;;  %v610_v59 = vadd.f32 %v1508_v34, %v609_v55 }
 0x10e   :  { %v1181_v56 = vpack.c.bf16 %v663_v46, %v663_v46  ;;  %v664_v58 = vmax.f32 %v490_v48, 0.0  ;;  %v1213_v60 = vpack.c.bf16 %v695_v51, %v695_v51  ;;  %v696_v62 = vmax.f32 %v618_v53, 0.0 }
 0x10f   :  { %v1179_v61 = vpack.c.bf16 %v661_v52, %v661_v52  ;;  %v662_v63 = vmax.f32 %v482_v54, 0.0  ;;  %v1211_v0 = vpack.c.bf16 %v693_v57, %v693_v57  ;;  %v694_v2 = vmax.f32 %v610_v59, 0.0 }
 0x110   :  { %984 = vst.msk [vmem:[%s1833_s3 + $0x68] sm:$0xf] %vm957_vm2, %v1181_v56  ;;  %v1182_v1 = vpack.c.bf16 %v664_v58, %v664_v58  ;;  %1016 = vst.msk [vmem:[%s1833_s3 + $0xe8] sm:$0xf] %vm957_vm2, %v1213_v60  ;;  %v1214_v3 = vpack.c.bf16 %v696_v62, %v696_v62 }
 0x111   :  { %982 = vst.msk [vmem:[%s1833_s3 + $0x60] sm:$0xf] %vm957_vm2, %v1179_v61  ;;  %v1180_v4 = vpack.c.bf16 %v662_v63, %v662_v63  ;;  %v1284_v5 = vpop.f32.mrb[28].mxu0  ;;  %1014 = vst.msk [vmem:[%s1833_s3 + $0xe0] sm:$0xf] %vm957_vm2, %v1211_v0  ;;  %v1212_v6 = vpack.c.bf16 %v694_v2, %v694_v2  ;;  %v1316_v8 = vpop.f32.mrb[28].mxu1 }
 0x112   :  { %985 = vst.msk [vmem:[%s1833_s3 + $0x6c] sm:$0xf] %vm957_vm2, %v1182_v1  ;;  %v503_v7 = vadd.f32 %v1284_v5, %v1508_v34  ;;  %v494_v9 = vpop.f32.mrb[29].mxu0  ;;  %1017 = vst.msk [vmem:[%s1833_s3 + $0xec] sm:$0xf] %vm957_vm2, %v1214_v3  ;;  %v631_v10 = vadd.f32 %v1316_v8, %v1508_v34  ;;  %v622_v12 = vpop.f32.mrb[29].mxu1 }
 0x113   :  { %983 = vst.msk [vmem:[%s1833_s3 + $0x64] sm:$0xf] %vm957_vm2, %v1180_v4  ;;  %v495_v11 = vadd.f32 %v1508_v34, %v494_v9  ;;  %v1285_v13 = vpop.f32.mrb[30].mxu0  ;;  %1015 = vst.msk [vmem:[%s1833_s3 + $0xe4] sm:$0xf] %vm957_vm2, %v1212_v6  ;;  %v623_v15 = vadd.f32 %v1508_v34, %v622_v12  ;;  %v1317_v17 = vpop.f32.mrb[30].mxu1 }
 0x114   :  { %v667_v14 = vmax.f32 %v503_v7, 0.0  ;;  %v506_v16 = vadd.f32 %v1285_v13, %v1508_v34  ;;  %v497_v18 = vpop.f32.mrb[31].mxu0  ;;  %v699_v19 = vmax.f32 %v631_v10, 0.0  ;;  %v634_v21 = vadd.f32 %v1317_v17, %v1508_v34  ;;  %v625_v23 = vpop.f32.mrb[31].mxu1 }
 0x115   :  { %v665_v20 = vmax.f32 %v495_v11, 0.0  ;;  %v498_v22 = vadd.f32 %v1508_v34, %v497_v18  ;;  %v697_v25 = vmax.f32 %v623_v15, 0.0  ;;  %v626_v27 = vadd.f32 %v1508_v34, %v625_v23 }
 0x116   :  { %v1185_v24 = vpack.c.bf16 %v667_v14, %v667_v14  ;;  %v668_v26 = vmax.f32 %v506_v16, 0.0  ;;  %v1217_v28 = vpack.c.bf16 %v699_v19, %v699_v19  ;;  %v700_v30 = vmax.f32 %v634_v21, 0.0 }
 0x117   :  { %v1183_v29 = vpack.c.bf16 %v665_v20, %v665_v20  ;;  %v666_v31 = vmax.f32 %v498_v22, 0.0  ;;  %v1215_v32 = vpack.c.bf16 %v697_v25, %v697_v25  ;;  %v698_v35 = vmax.f32 %v626_v27, 0.0 }
 0x118   :  { %988 = vst.msk [vmem:[%s1833_s3 + $0x78] sm:$0xf] %vm957_vm2, %v1185_v24  ;;  %v1186_v33 = vpack.c.bf16 %v668_v26, %v668_v26  ;;  %1020 = vst.msk [vmem:[%s1833_s3 + $0xf8] sm:$0xf] %vm957_vm2, %v1217_v28  ;;  %v1218_v34 = vpack.c.bf16 %v700_v30, %v700_v30 }
 0x119   :  { %986 = vst.msk [vmem:[%s1833_s3 + $0x70] sm:$0xf] %vm957_vm2, %v1183_v29  ;;  %v1184_v36 = vpack.c.bf16 %v666_v31, %v666_v31  ;;  %1018 = vst.msk [vmem:[%s1833_s3 + $0xf0] sm:$0xf] %vm957_vm2, %v1215_v32  ;;  %v1216_v37 = vpack.c.bf16 %v698_v35, %v698_v35 }
 0x11a   :  { %989 = vst.msk [vmem:[%s1833_s3 + $0x7c] sm:$0xf] %vm957_vm2, %v1186_v33  ;;  %1021 = vst.msk [vmem:[%s1833_s3 + $0xfc] sm:$0xf] %vm957_vm2, %v1218_v34 }
 0x11b   :  { %987 = vst.msk [vmem:[%s1833_s3 + $0x74] sm:$0xf] %vm957_vm2, %v1184_v36  ;;  %1019 = vst.msk [vmem:[%s1833_s3 + $0xf4] sm:$0xf] %vm957_vm2, %v1216_v37 }

</bundles_post_ra>
